<compile_context>
chip_gen: v7x
topology: tpu7x:2x2x1
jax: 0.10.0
libtpu: 0.0.40
codegen_flags: <defaults>
</compile_context>

<pallas_src>
import functools

import jax
import jax.numpy as jnp
from jax.experimental import pallas as pl
from jax.experimental.pallas import tpu as pltpu

HIDDEN_LAYER_SIZE = 50


def _exponent_ode_kernel(yT_ref, w1T_ref, b1_ref, w2T_ref, b2_ref, outT_ref,
                         feat_ref, *, exponent_count: int, dim: int):
    yT = yT_ref[...]                      # (d, tb)   batch on lanes -> dense vregs
    b1 = b1_ref[...]                      # (H_pad, 1)  read once (hoisted)
    b2 = b2_ref[...]                      # (d, 1)

    # Stack the power features into a VMEM scratch slab: feat[k*d:(k+1)*d, :] = y**(k+1).
    # Iterated multiplication gives exact integer powers (matches torch.pow, incl.
    # negative bases).  Static sublane slices -> cheap store-slot writes.
    p = yT
    feat_ref[0:dim, :] = p
    for k in range(1, exponent_count):
        p = p * yT
        feat_ref[k * dim:(k + 1) * dim, :] = p

    # Layer 1 as a single K = E*d MXU matmul (same reduction order as the reference).
    acc = jnp.dot(w1T_ref[...], feat_ref[...],
                  preferred_element_type=jnp.float32)        # (H_pad, tb)
    h = jnp.tanh(acc + b1)                                    # padded rows stay 0
    outT = jnp.dot(w2T_ref[...], h,
                   preferred_element_type=jnp.float32) + b2   # (d, tb)
    outT_ref[...] = outT.astype(outT_ref.dtype)


def exponent_ode_func(y, w1, b1, w2, b2, *, exponent_count: int, block_batch=None):
    """Forward pass of ExponentODEFunc.

    y : (B, d) f32,  w1 : (E*d, H),  b1 : (H,) or (1, H),  w2 : (H, d),
    b2 : (d,) or (1, d).  Returns (B, d) f32.  (The ODE time `t` is unused, as in
    the PyTorch module.)
    """
    B, d = y.shape
    in_features, H = w1.shape
    assert in_features == exponent_count * d

    # --- wrapper-side layout hygiene (all exact transforms) -------------------
    # Pad the hidden dim to a full 128-lane span; store both layers transposed so
    # the kernel computes accT = W1^T @ featT and outT = W2^T @ hT.
    H_pad = ((H + 127) // 128) * 128
    w1T = jnp.zeros((H_pad, in_features), jnp.float32).at[:H, :].set(
        jnp.transpose(w1).astype(jnp.float32))
    b1c = jnp.zeros((H_pad, 1), jnp.float32).at[:H, 0].set(
        jnp.reshape(b1, (-1,)).astype(jnp.float32))
    w2T = jnp.zeros((d, H_pad), jnp.float32).at[:, :H].set(
        jnp.transpose(w2).astype(jnp.float32))
    b2c = jnp.reshape(b2, (d, 1)).astype(jnp.float32)

    # Transposed (d, B) orientation: batch on lanes (layout plumbing only).
    yT = jnp.transpose(y).astype(jnp.float32)                 # (d, B)

    # --- batch tile: the main tuning knob --------------------------------------
    # Per-batch-column VMEM bytes: y/out double-buffered + feature slab + acc/h temps.
    per_col_bytes = 4 * (2 * 2 * d + exponent_count * d + 2 * H_pad)
    if block_batch is None:
        # Budget-derived (~12 MiB of per-step tiles), capped at 8192 columns.
        tb = min(8192, max(128, (12 << 20) // per_col_bytes))
        tb = max(128, (tb // 128) * 128)
        # Keep the grid >= 4 steps when B allows it: feeds both v7x TensorCores
        # under dimension_semantics=("parallel",) and keeps the pipeline deep.
        while tb > 256 and pl.cdiv(B, tb) < 4:
            tb //= 2
    else:
        tb = max(128, ((block_batch + 127) // 128) * 128)     # lane multiple of 128

    B_pad = pl.cdiv(B, tb) * tb
    if B_pad != B:
        yT = jnp.zeros((d, B_pad), jnp.float32).at[:, :B].set(yT)

    grid = (B_pad // tb,)

    # Explicit VMEM budget (portable: v7x has 64 MiB physical / 32 MiB default scope,
    # v5e only 16 MiB default scope).  2x headroom, floor 16 MiB, cap 40 MiB.
    weight_bytes = 4 * (w1T.size + b1c.size + w2T.size + b2c.size)
    vmem_limit = int(min(max(2 * (weight_bytes + per_col_bytes * tb), 16 << 20),
                         40 << 20))

    cost = pl.CostEstimate(
        flops=int(2 * B * (in_features * H_pad + H_pad * d)),
        transcendentals=int(B * H_pad),
        bytes_accessed=int(4 * 2 * B * d + weight_bytes),
    )

    kernel = functools.partial(_exponent_ode_kernel,
                               exponent_count=exponent_count, dim=d)

    outT = pl.pallas_call(
        kernel,
        out_shape=jax.ShapeDtypeStruct((d, B_pad), jnp.float32),
        grid=grid,
        in_specs=[
            pl.BlockSpec((d, tb), lambda i: (0, i)),                # yT tile (streamed)
            pl.BlockSpec((H_pad, in_features), lambda i: (0, 0)),   # W1^T (VMEM-resident)
            pl.BlockSpec((H_pad, 1), lambda i: (0, 0)),             # b1   (resident)
            pl.BlockSpec((d, H_pad), lambda i: (0, 0)),             # W2^T (resident)
            pl.BlockSpec((d, 1), lambda i: (0, 0)),                 # b2   (resident)
        ],
        out_specs=pl.BlockSpec((d, tb), lambda i: (0, i)),          # outT tile
        scratch_shapes=[pltpu.VMEM((in_features, tb), jnp.float32)],  # power-feature slab
        compiler_params=pltpu.CompilerParams(
            dimension_semantics=("parallel",),
            vmem_limit_bytes=vmem_limit,
        ),
        cost_estimate=cost,
    )(yT, w1T, b1c, w2T, b2c)

    # Padded batch columns are bias-only garbage; slice them off (do not remove).
    return jnp.transpose(outT[:, :B])


def reference_forward(y, w1, b1, w2, b2, *, exponent_count: int):
    """Plain-JAX reference mirroring the PyTorch module exactly."""
    d = y.shape[-1]
    exp_vec = jnp.repeat(jnp.arange(1, exponent_count + 1), d).astype(jnp.float32)
    feats = jnp.power(jnp.tile(y, (1, exponent_count)), exp_vec)
    h = jnp.tanh(feats @ w1 + jnp.reshape(b1, (1, -1)))
    return h @ w2 + jnp.reshape(b2, (1, -1))


if __name__ == "__main__":
    DIMENSION = 4
    EXPONENT_COUNT = 8
    BATCH = 300          # deliberately not a multiple of the 128-lane batch tile

    key = jax.random.PRNGKey(0)
    k_y, k_w1, k_w2 = jax.random.split(key, 3)

    in_features = DIMENSION * EXPONENT_COUNT
    # Deterministic parameter init mirroring nn.init.normal_(std=0.1), bias = 0.
    w1 = (0.1 * jax.random.normal(k_w1, (in_features, HIDDEN_LAYER_SIZE))).astype(jnp.float32)
    b1 = jnp.zeros((HIDDEN_LAYER_SIZE,), jnp.float32)
    w2 = (0.1 * jax.random.normal(k_w2, (HIDDEN_LAYER_SIZE, DIMENSION))).astype(jnp.float32)
    b2 = jnp.zeros((DIMENSION,), jnp.float32)

    # Example state y (t is unused by the forward, as in the PyTorch module).
    y = (0.5 * jax.random.normal(k_y, (BATCH, DIMENSION))).astype(jnp.float32)

    # Small 128-column batch tile so this tiny demo still exercises the multi-step
    # grid, batch padding, and VMEM-resident weights (production default is larger).
    out = exponent_ode_func(y, w1, b1, w2, b2,
                            exponent_count=EXPONENT_COUNT, block_batch=128)
    out = jax.block_until_ready(out)

    ref = reference_forward(y, w1, b1, w2, b2, exponent_count=EXPONENT_COUNT)
    assert out.shape == (BATCH, DIMENSION)
    assert jnp.allclose(out, ref, atol=1e-5, rtol=1e-5), \
        float(jnp.max(jnp.abs(out - ref)))

    print("KERNEL_OK")
</pallas_src>

<mosaic_0001>
module attributes {stable_mosaic.version = 11 : i64} {
  func.func @_exponent_ode_kernel(%arg0: i32, %arg1: memref<4x128xf32, #tpu.memory_space<vmem>>, %arg2: memref<128x32xf32, #tpu.memory_space<vmem>>, %arg3: memref<128x1xf32, #tpu.memory_space<vmem>>, %arg4: memref<4x128xf32, #tpu.memory_space<vmem>>, %arg5: memref<4x1xf32, #tpu.memory_space<vmem>>, %arg6: memref<4x128xf32, #tpu.memory_space<vmem>>, %arg7: memref<32x128xf32, #tpu.memory_space<vmem>>) attributes {dimension_semantics = [#tpu.dimension_semantics<parallel>], iteration_bounds = array<i64: 3>, scalar_prefetch = 0 : i64, scratch_operands = 1 : i64, tpu.core_type = #tpu.core_type<tc>, window_params = [{transform_indices = @transform_0, window_bounds = array<i64: 4, 128>}, {pipeline_mode = #tpu.pipeline_mode<synchronous>, transform_indices = @transform_1, window_bounds = array<i64: 128, 32>}, {pipeline_mode = #tpu.pipeline_mode<synchronous>, transform_indices = @transform_2, window_bounds = array<i64: 128, 1>}, {pipeline_mode = #tpu.pipeline_mode<synchronous>, transform_indices = @transform_3, window_bounds = array<i64: 4, 128>}, {pipeline_mode = #tpu.pipeline_mode<synchronous>, transform_indices = @transform_4, window_bounds = array<i64: 4, 1>}, {transform_indices = @transform_5, window_bounds = array<i64: 4, 128>}]} {
    %c0 = arith.constant 0 : index
    %c0_0 = arith.constant 0 : index
    %0 = vector.load %arg1[%c0, %c0_0] : memref<4x128xf32, #tpu.memory_space<vmem>>, vector<4x128xf32>
    %c0_1 = arith.constant 0 : index
    %c0_2 = arith.constant 0 : index
    %1 = vector.load %arg3[%c0_1, %c0_2] : memref<128x1xf32, #tpu.memory_space<vmem>>, vector<128x1xf32>
    %c0_3 = arith.constant 0 : index
    %c0_4 = arith.constant 0 : index
    %2 = vector.load %arg5[%c0_3, %c0_4] : memref<4x1xf32, #tpu.memory_space<vmem>>, vector<4x1xf32>
    %c0_5 = arith.constant 0 : index
    %c0_6 = arith.constant 0 : index
    %3 = vector.load %arg7[%c0_5, %c0_6] : memref<32x128xf32, #tpu.memory_space<vmem>>, vector<4x128xf32>
    tpu.vector_store %arg7[%c0_5, %c0_6], %0 {strides = array<i32>} : memref<32x128xf32, #tpu.memory_space<vmem>>, vector<4x128xf32>,
    %4 = arith.mulf %0, %0 : vector<4x128xf32>
    %c4 = arith.constant 4 : index
    %c0_7 = arith.constant 0 : index
    %5 = vector.load %arg7[%c4, %c0_7] : memref<32x128xf32, #tpu.memory_space<vmem>>, vector<4x128xf32>
    tpu.vector_store %arg7[%c4, %c0_7], %4 {strides = array<i32>} : memref<32x128xf32, #tpu.memory_space<vmem>>, vector<4x128xf32>,
    %6 = arith.mulf %4, %0 : vector<4x128xf32>
    %c8 = arith.constant 8 : index
    %c0_8 = arith.constant 0 : index
    %7 = vector.load %arg7[%c8, %c0_8] : memref<32x128xf32, #tpu.memory_space<vmem>>, vector<4x128xf32>
    tpu.vector_store %arg7[%c8, %c0_8], %6 {strides = array<i32>} : memref<32x128xf32, #tpu.memory_space<vmem>>, vector<4x128xf32>,
    %8 = arith.mulf %6, %0 : vector<4x128xf32>
    %c12 = arith.constant 12 : index
    %c0_9 = arith.constant 0 : index
    %9 = vector.load %arg7[%c12, %c0_9] : memref<32x128xf32, #tpu.memory_space<vmem>>, vector<4x128xf32>
    tpu.vector_store %arg7[%c12, %c0_9], %8 {strides = array<i32>} : memref<32x128xf32, #tpu.memory_space<vmem>>, vector<4x128xf32>,
    %10 = arith.mulf %8, %0 : vector<4x128xf32>
    %c16 = arith.constant 16 : index
    %c0_10 = arith.constant 0 : index
    %11 = vector.load %arg7[%c16, %c0_10] : memref<32x128xf32, #tpu.memory_space<vmem>>, vector<4x128xf32>
    tpu.vector_store %arg7[%c16, %c0_10], %10 {strides = array<i32>} : memref<32x128xf32, #tpu.memory_space<vmem>>, vector<4x128xf32>,
    %12 = arith.mulf %10, %0 : vector<4x128xf32>
    %c20 = arith.constant 20 : index
    %c0_11 = arith.constant 0 : index
    %13 = vector.load %arg7[%c20, %c0_11] : memref<32x128xf32, #tpu.memory_space<vmem>>, vector<4x128xf32>
    tpu.vector_store %arg7[%c20, %c0_11], %12 {strides = array<i32>} : memref<32x128xf32, #tpu.memory_space<vmem>>, vector<4x128xf32>,
    %14 = arith.mulf %12, %0 : vector<4x128xf32>
    %c24 = arith.constant 24 : index
    %c0_12 = arith.constant 0 : index
    %15 = vector.load %arg7[%c24, %c0_12] : memref<32x128xf32, #tpu.memory_space<vmem>>, vector<4x128xf32>
    tpu.vector_store %arg7[%c24, %c0_12], %14 {strides = array<i32>} : memref<32x128xf32, #tpu.memory_space<vmem>>, vector<4x128xf32>,
    %16 = arith.mulf %14, %0 : vector<4x128xf32>
    %c28 = arith.constant 28 : index
    %c0_13 = arith.constant 0 : index
    %17 = vector.load %arg7[%c28, %c0_13] : memref<32x128xf32, #tpu.memory_space<vmem>>, vector<4x128xf32>
    tpu.vector_store %arg7[%c28, %c0_13], %16 {strides = array<i32>} : memref<32x128xf32, #tpu.memory_space<vmem>>, vector<4x128xf32>,
    %c0_14 = arith.constant 0 : index
    %c0_15 = arith.constant 0 : index
    %18 = vector.load %arg2[%c0_14, %c0_15] : memref<128x32xf32, #tpu.memory_space<vmem>>, vector<128x32xf32>
    %c0_16 = arith.constant 0 : index
    %c0_17 = arith.constant 0 : index
    %19 = vector.load %arg7[%c0_16, %c0_17] : memref<32x128xf32, #tpu.memory_space<vmem>>, vector<32x128xf32>
    %cst = arith.constant dense<0.000000e+00> : vector<128x128xf32>
    %20 = tpu.matmul %18, %19, %cst {dimension_numbers = #tpu.dot_dimension_numbers<[1], [0], [0], [1], [0, 0, 1, 1], [], []>} : vector<128x32xf32>, vector<32x128xf32>, vector<128x128xf32> -> vector<128x128xf32>
    %21 = vector.broadcast %1 : vector<128x1xf32> to vector<128x128xf32>
    %22 = arith.addf %20, %21 : vector<128x128xf32>
    %23 = math.tanh %22 : vector<128x128xf32>
    %c0_18 = arith.constant 0 : index
    %c0_19 = arith.constant 0 : index
    %24 = vector.load %arg4[%c0_18, %c0_19] : memref<4x128xf32, #tpu.memory_space<vmem>>, vector<4x128xf32>
    %cst_20 = arith.constant dense<0.000000e+00> : vector<4x128xf32>
    %25 = tpu.matmul %24, %23, %cst_20 {dimension_numbers = #tpu.dot_dimension_numbers<[1], [0], [0], [1], [0, 0, 1, 1], [], []>} : vector<4x128xf32>, vector<128x128xf32>, vector<4x128xf32> -> vector<4x128xf32>
    %26 = vector.broadcast %2 : vector<4x1xf32> to vector<4x128xf32>
    %27 = arith.addf %25, %26 : vector<4x128xf32>
    %c0_21 = arith.constant 0 : index
    %c0_22 = arith.constant 0 : index
    %28 = vector.load %arg6[%c0_21, %c0_22] : memref<4x128xf32, #tpu.memory_space<vmem>>, vector<4x128xf32>
    tpu.vector_store %arg6[%c0_21, %c0_22], %27 {strides = array<i32>} : memref<4x128xf32, #tpu.memory_space<vmem>>, vector<4x128xf32>,
    return
  }
  func.func @transform_0(%arg0: i32) -> (i32, i32) {
    %c0_i32 = arith.constant 0 : i32
    %c0_i32_0 = arith.constant 0 : i32
    return %c0_i32, %arg0 : i32, i32
  }
  func.func @transform_1(%arg0: i32) -> (i32, i32) {
    %c0_i32 = arith.constant 0 : i32
    %c0_i32_0 = arith.constant 0 : i32
    %c0_i32_1 = arith.constant 0 : i32
    return %c0_i32, %c0_i32_0 : i32, i32
  }
  func.func @transform_2(%arg0: i32) -> (i32, i32) {
    %c0_i32 = arith.constant 0 : i32
    %c0_i32_0 = arith.constant 0 : i32
    %c0_i32_1 = arith.constant 0 : i32
    return %c0_i32, %c0_i32_0 : i32, i32
  }
  func.func @transform_3(%arg0: i32) -> (i32, i32) {
    %c0_i32 = arith.constant 0 : i32
    %c0_i32_0 = arith.constant 0 : i32
    %c0_i32_1 = arith.constant 0 : i32
    return %c0_i32, %c0_i32_0 : i32, i32
  }
  func.func @transform_4(%arg0: i32) -> (i32, i32) {
    %c0_i32 = arith.constant 0 : i32
    %c0_i32_0 = arith.constant 0 : i32
    %c0_i32_1 = arith.constant 0 : i32
    return %c0_i32, %c0_i32_0 : i32, i32
  }
  func.func @transform_5(%arg0: i32) -> (i32, i32) {
    %c0_i32 = arith.constant 0 : i32
    %c0_i32_0 = arith.constant 0 : i32
    return %c0_i32, %arg0 : i32, i32
  }
}

</mosaic_0001>

<bundles_post_ra>
// kernel: tpu_custom_call.1
= control target key start
LH: loop header
LB: loop body
LE: loop exit
PB: predicated region body
PF: predicated region fallthrough
CT: control target
= control target key end

     0   :  { %10 = vsyncpa [#allocation4], 0  ;;  %s1277_s0 = inlined_call_operand.vmem [shape: f32[4,384], index: 0, kind: input, shape index: {}]   ;;  %s1278_s1 = inlined_call_operand.vmem [shape: f32[128,32], index: 1, kind: input, shape index: {}]   ;;  %s1279_s2 = inlined_call_operand.vmem [shape: f32[128,1], index: 2, kind: input, shape index: {}]   ;;  %s1280_s3 = inlined_call_operand.vmem [shape: f32[4,128], index: 3, kind: input, shape index: {}]   ;;  %s1281_s4 = inlined_call_operand.vmem [shape: f32[4,1], index: 4, kind: input, shape index: {}]   ;;  %s1282_s5 = inlined_call_operand.hbm [shape: f32[4,384], index: 5, kind: output, shape index: {}]  }
   0x1   :  { %12 = vsyncpa [#allocation4 + $0x1], 0  ;;  %s1051_s18 = smov 0   ;;  %s1053_s19 = smov 0  }
   0x2   :  { %s1055_s20 = smov 0   ;;  %s1057_s21 = smov 0  }
   0x3 LB: > { %s1072_s22 = sadd.s32 4294967295, %s1014_s21   ;;  %s713_s23 = sadd.s32 4294967294, %s1014_s21   ;;  %s1014_s21 = sphi %s1057_s21, %s1288_s21   ;;  %s1010_s20 = sphi %s1055_s20, %s1287_s20   ;;  %s1006_s19 = sphi %s1053_s19, %s1286_s19   ;;  %s1002_s18 = sphi %s1051_s18, %s1285_s18  }
   0x4   : > { %s1076_s24 = sadd.s32 1, %s1014_s21   ;;  %s135_s25 = sadd.s32 1, %s1010_s20 }
   0x5   : > { %s132_s26 = ssub.s32 %s1014_s21, %s1076_s24  ;;  %p145_p0 = scmp.ne.s32.totalorder %s1010_s20, %s1006_s19 }
   0x6   : > { %p133_p1 = scmp.eq.s32.totalorder %s132_s26, 0  ;;  %p146_p2 = scmp.eq.s32.totalorder %s1072_s22, 2 }
   0x7   : > { %p151_p3 = scmp.ne.s32.totalorder %s1006_s19, %s1002_s18  ;;  %p152_p4 = scmp.eq.s32.totalorder %s713_s23, 2 }
   0x8   : > { %s1087_s27 = scalar_select %p133_p1, %s1010_s20, %s135_s25  }
   0x9   : > { %p1089_p5 = por %p146_p2, %p145_p0  ;;  %p1093_p6 = por %p152_p4, %p151_p3 }
   0xa   : > { %p716_p7 = scmp.ge.s32.totalorder %s1014_s21, 1  ;;  %p189_p8 = scmp.lt.s32.totalorder %s1014_s21, 4 }
   0xc   : > { %p190_p9 = pnand %p716_p7, %p189_p8 }
   0xd   : > { %p216_p10 = scmp.lt.s32.totalorder (!%p190_p9), %s1072_s22, 2  ;;  %v253_v0 = vld [vmem:[%s1278_s1] sm:$0xff] (!%p190_p9)  ;;  %vm353_vm0 = vcmask (!%p190_p9), 261120   ;;  %v1016_v1 = vmov (!%p190_p9), 0   ;;  %v223_v4 = vld [vmem:[%s1279_s2 + $0x10] sm:$0xff] (!%p190_p9)  ;;  %v222_v6 = vld [vmem:[%s1279_s2 + $0x8] sm:$0xff] (!%p190_p9) }
   0xe   : > { %193 = sbr.rel (%p190_p9) target bundleno = 541 (0x21d), region = 40  ;;  %784 = vmatprep.mubr.msk.f32.mxu0 (!%p190_p9), %vm353_vm0, %v253_v0  ;;  %918 = vset.pattern.permute.xlu0 (!%p190_p9), %v1016_v1  ;;  %v221_v2 = vld [vmem:[%s1279_s2] sm:$0xff] (!%p190_p9)  ;;  %v224_v7 = vld [vmem:[%s1279_s2 + $0x18] sm:$0xff] (!%p190_p9)  ;;  %v226_v11 = vld [vmem:[%s1279_s2 + $0x28] sm:$0xff] (!%p190_p9)  ;;  %v1017_v48 = vmov (!%p190_p9), 0.0|0.0   ;;  %vm1018_vm1 = vmmov (!%p190_p9), 0  }
   0xf   : > { %919 = vset.pattern.permute.xlu1 (!%p190_p9), %v1016_v1  ;;  %275 = vperm.xlu0 (!%p190_p9), %918, %v221_v2   ;;  %v225_v10 = vld [vmem:[%s1279_s2 + $0x20] sm:$0xff] (!%p190_p9)  ;;  %v227_v14 = vld [vmem:[%s1279_s2 + $0x30] sm:$0xff] (!%p190_p9)  ;;  %v228_v15 = vld [vmem:[%s1279_s2 + $0x38] sm:$0xff] (!%p190_p9)  ;;  %v1019_v49 = vmov (!%p190_p9), 0.0   ;;  %s213_s14 = sand.u32 (!%p190_p9), 1, %s1006_s19   ;;  %s736_s16 = sshll.u32 (!%p190_p9), %s1072_s22, 6 }
  0x10   : > { %285 = vperm.xlu1 (!%p190_p9), %919, %v223_v4   ;;  %v229_v19 = vld [vmem:[%s1279_s2 + $0x40] sm:$0xff] (!%p190_p9)  ;;  %v230_v21 = vld [vmem:[%s1279_s2 + $0x48] sm:$0xff] (!%p190_p9)  ;;  %v231_v23 = vld [vmem:[%s1279_s2 + $0x50] sm:$0xff] (!%p190_p9)  ;;  %851 = vmatprep.subr.bf16.mxu1 (!%p190_p9), %v1017_v48  ;;  %s717_s15 = sshll.u32 (!%p190_p9), %s213_s14, 2  ;;  %s1235_s30 = scalar_lea.hbm (!%p190_p9), %s1282_s5, %s736_s16 }
  0x11   : > { %v232_v24 = vld [vmem:[%s1279_s2 + $0x58] sm:$0xff] (!%p190_p9)  ;;  %v233_v26 = vld [vmem:[%s1279_s2 + $0x60] sm:$0xff] (!%p190_p9)  ;;  %v234_v28 = vld [vmem:[%s1279_s2 + $0x68] sm:$0xff] (!%p190_p9)  ;;  %840 = vmatprep.mubr.msk.f32.mxu1 (!%p190_p9), %vm1018_vm1, %v1019_v49  ;;  %s215_s17 = scalar_lea.vmem (!%p190_p9), [#allocation3], %s717_s15  ;;  %s641_s6 = scalar_lea.sflag (!%p190_p9), [#allocation4], %s213_s14 }
  0x12   : > { %v235_v30 = vld [vmem:[%s1279_s2 + $0x70] sm:$0xff] (!%p190_p9)  ;;  %v254_v31 = vld [vmem:[%s1278_s1 + $0x8] sm:$0xff] (!%p190_p9)  ;;  %v236_v32 = vld [vmem:[%s1279_s2 + $0x78] sm:$0xff] (!%p190_p9)  ;;  %s654_s23 = sshll.u32 (!%p190_p9), %s215_s17, 4  ;;  %s1237_s23 = int_to_ptr.vmem [resolvable:$true] %s654_s23 }
  0x13   : > { %280 = vperm.xlu0 (!%p190_p9), %918, %v222_v6   ;;  %v255_v33 = vld [vmem:[%s1278_s1 + $0x10] sm:$0xff] (!%p190_p9)  ;;  %v237_v34 = vld [vmem:[%s1281_s4] sm:$0xf] (!%p190_p9)  ;;  %v256_v35 = vld [vmem:[%s1278_s1 + $0x18] sm:$0xff] (!%p190_p9) }
  0x14   : > { %290 = vperm.xlu1 (!%p190_p9), %919, %v224_v7   ;;  %v257_v36 = vld [vmem:[%s1278_s1 + $0x20] sm:$0xff] (!%p190_p9)  ;;  %v258_v37 = vld [vmem:[%s1278_s1 + $0x28] sm:$0xff] (!%p190_p9)  ;;  %v259_v38 = vld [vmem:[%s1278_s1 + $0x30] sm:$0xff] (!%p190_p9) }
  0x15   : > { %s217_s7 = scalar_select %p216_p10, %s1072_s22, 2  ;;  %v260_v39 = vld [vmem:[%s1278_s1 + $0x38] sm:$0xff]  ;;  %v261_v40 = vld [vmem:[%s1278_s1 + $0x40] sm:$0xff]  ;;  %v262_v41 = vld [vmem:[%s1278_s1 + $0x48] sm:$0xff] }
  0x16   : > { %v263_v42 = vld [vmem:[%s1278_s1 + $0x50] sm:$0xff]  ;;  %v264_v43 = vld [vmem:[%s1278_s1 + $0x58] sm:$0xff]  ;;  %v265_v44 = vld [vmem:[%s1278_s1 + $0x60] sm:$0xff]  ;;  %s1020_s22 = smov [#allocation3]  }
  0x17   : > { %s718_s8 = sshll.u32 %s217_s7, 2  ;;  %295 = vperm.xlu0 %918, %v225_v10   ;;  %v266_v45 = vld [vmem:[%s1278_s1 + $0x68] sm:$0xff]  ;;  %v267_v46 = vld [vmem:[%s1278_s1 + $0x70] sm:$0xff]  ;;  %v268_v47 = vld [vmem:[%s1278_s1 + $0x78] sm:$0xff]  ;;  %s952_s7 = scalar_lea.vmem %s1237_s23, 64 }
  0x18   : > { %s219_s11 = scalar_lea.vmem %s1277_s0, %s718_s8  ;;  %300 = vperm.xlu1 %919, %v226_v11   ;;  %p953_p11 = scmp.ne.s32.totalorder %s1237_s23, %s952_s7 }
  0x19   : > { %v220_v3 = vld [vmem:[%s219_s11] sm:$0xf]  ;;  %s956_s8 = sshll.u32 %s1020_s22, 4  ;;  %s957_s8 = int_to_ptr.vmem [resolvable:$false] %s956_s8 }
  0x1a   : > { %238 = vst [vmem:[#allocation2] sm:$0xf] %v220_v3  ;;  %v239_v5 = vmul.f32 %v220_v3, %v220_v3  ;;  %p954_p12 = pnand %p953_p11, %p1089_p5  ;;  %s958_s9 = scalar_lea.vmem %s957_s8, 128 }
  0x1b   : > { %305 = vperm.xlu0 %918, %v227_v14   ;;  %p959_p0 = scmp.lt.s32.totalorder %s1237_s23, %s957_s8  ;;  %p960_p1 = scmp.lt.s32.totalorder %s958_s9, %s952_s7 }
  0x1c   : > { %240 = vst [vmem:[#allocation2 + $0x4] sm:$0xf] %v239_v5  ;;  %v241_v8 = vmul.f32 %v239_v5, %v220_v3  ;;  %310 = vperm.xlu1 %919, %v228_v15   ;;  %p955_p13 = pneg %p954_p12 }
  0x1d   : > { %p961_p2 = por %p960_p1, %p959_p0 }
  0x1e   : > { %242 = vst [vmem:[#allocation2 + $0x8] sm:$0xf] %v241_v8  ;;  %v243_v9 = vmul.f32 %v241_v8, %v220_v3 }
  0x1f   : > { %315 = vperm.xlu0 %918, %v229_v19   ;;  %p962_p3 = pnand %p961_p2, %p955_p13 }
  0x20   : > { %244 = vst [vmem:[#allocation2 + $0xc] sm:$0xf] %v243_v9  ;;  %v245_v12 = vmul.f32 %v243_v9, %v220_v3  ;;  %320 = vperm.xlu1 %919, %v230_v21  }
  0x22   : > { %246 = vst [vmem:[#allocation2 + $0x10] sm:$0xf] %v245_v12  ;;  %v247_v13 = vmul.f32 %v245_v12, %v220_v3 }
  0x23   : > { %v269_v17 = vld [vmem:[#allocation2] sm:$0xff]  ;;  %325 = vperm.xlu0 %918, %v231_v23  }
  0x24   : > { %248 = vst [vmem:[#allocation2 + $0x14] sm:$0xf] %v247_v13  ;;  %v249_v16 = vmul.f32 %v247_v13, %v220_v3  ;;  %330 = vperm.xlu1 %919, %v232_v24  }
  0x26   : > { %250 = vst [vmem:[#allocation2 + $0x18] sm:$0xf] %v249_v16  ;;  %v251_v18 = vmul.f32 %v249_v16, %v220_v3 }
  0x27   : > { %v270_v20 = vld [vmem:[#allocation2 + $0x8] sm:$0xff]  ;;  %335 = vperm.xlu0 %918, %v233_v26  }
  0x28   : > { %v843_v22 = vpack.c.bf16 %v270_v20, %v269_v17  ;;  %252 = vst [vmem:[#allocation2 + $0x1c] sm:$0xf] %v251_v18  ;;  %340 = vperm.xlu1 %919, %v234_v28  }
  0x2a   : > { %844 = vmatprep.subr.bf16.mxu0 %v843_v22 }
  0x2b   : > { %846 = vmatpush3.bf16.msra.mxu0 %v843_v22  ;;  %v271_v25 = vld [vmem:[#allocation2 + $0x10] sm:$0xff]  ;;  %345 = vperm.xlu0 %918, %v235_v30  }
  0x2c   : > { %350 = vperm.xlu1 %919, %v236_v32  }
  0x2f   : > { %v272_v27 = vld [vmem:[#allocation2 + $0x18] sm:$0xff]  ;;  %566 = vperm.xlu0 %918, %v237_v34  }
  0x30   : > { %v847_v29 = vpack.c.bf16 %v272_v27, %v271_v25 }
  0x32   : > { %848 = vmatprep.subr.bf16.mxu0 %v847_v29 }
  0x33   : > { %850 = vmatpush3.bf16.msra.mxu0 %v847_v29 }
  0x36   : > { %785 = vmatmul.mubr.msk.f32.vlgmr.msra.gmra.mrb[0].mxu0 %vm353_vm0, %v254_v31 }
  0x37   : > { %787 = vmatprep.mubr.msk.f32.mxu0 %vm353_vm0, %v255_v33 }
  0x3a   : > { %788 = vmatmul.mubr.msk.f32.gmra.mrb[2].mxu0 %vm353_vm0, %v256_v35 }
  0x3b   : > { %790 = vmatprep.mubr.msk.f32.mxu0 %vm353_vm0, %v257_v36 }
  0x3e   : > { %791 = vmatmul.mubr.msk.f32.gmra.mrb[4].mxu0 %vm353_vm0, %v258_v37 }
  0x3f   : > { %793 = vmatprep.mubr.msk.f32.mxu0 %vm353_vm0, %v259_v38 }
  0x42   : > { %794 = vmatmul.mubr.msk.f32.gmra.mrb[6].mxu0 %vm353_vm0, %v260_v39 }
  0x43   : > { %796 = vmatprep.mubr.msk.f32.mxu0 %vm353_vm0, %v261_v40 }
  0x46   : > { %797 = vmatmul.mubr.msk.f32.gmra.mrb[8].mxu0 %vm353_vm0, %v262_v41 }
  0x47   : > { %799 = vmatprep.mubr.msk.f32.mxu0 %vm353_vm0, %v263_v42 }
  0x4a   : > { %800 = vmatmul.mubr.msk.f32.gmra.mrb[10].mxu0 %vm353_vm0, %v264_v43 }
  0x4b   : > { %802 = vmatprep.mubr.msk.f32.mxu0 %vm353_vm0, %v265_v44 }
  0x4e   : > { %803 = vmatmul.mubr.msk.f32.gmra.mrb[12].mxu0 %vm353_vm0, %v266_v45 }
  0x4f   : > { %805 = vmatprep.mubr.msk.f32.mxu0 %vm353_vm0, %v267_v46 }
  0x52   : > { %806 = vmatmul.mubr.msk.f32.gmra.mrb[14].mxu0 %vm353_vm0, %v268_v47 }
  0x8e   : > { %v276_v51 = vpop.permute.xlu0 %275 }
  0x8f   : > { %v286_v50 = vpop.permute.xlu1 %285 }
  0x92   : > { %v281_v53 = vpop.permute.xlu0 %280 }
  0x93   : > { %v291_v52 = vpop.permute.xlu1 %290 }
  0x96   : > { %v296_v55 = vpop.permute.xlu0 %295 }
  0x97   : > { %v301_v54 = vpop.permute.xlu1 %300 }
  0x9a   : > { %v306_v62 = vpop.permute.xlu0 %305 }
  0x9b   : > { %v311_v60 = vpop.permute.xlu1 %310 }
  0x9e   : > { %v316_v7 = vpop.permute.xlu0 %315 }
  0x9f   : > { %v321_v5 = vpop.permute.xlu1 %320 }
  0xa2   : > { %v326_v18 = vpop.permute.xlu0 %325 }
  0xa3   : > { %v331_v15 = vpop.permute.xlu1 %330 }
  0xa6   : > { %v336_v31 = vpop.permute.xlu0 %335 }
  0xa7   : > { %v341_v29 = vpop.permute.xlu1 %340 }
  0xaa   : > { %v346_v43 = vpop.permute.xlu0 %345 }
  0xab   : > { %v351_v40 = vpop.permute.xlu1 %350 }
 0x109   : > { %v786_v56 = vpop.f32.mrb[0].mxu0 }
 0x10a   : > { %v474_v57 = vadd.f32 %v786_v56, %v281_v53  ;;  %v468_v58 = vpop.f32.mrb[1].mxu0 }
 0x10b   : > { %v469_v59 = vadd.f32 %v468_v58, %v276_v51 }
 0x10c   : > { %920 = vtanh.f32 %v474_v57 }
 0x10d   : > { %922 = vtanh.f32 %v469_v59  ;;  %v789_v61 = vpop.f32.mrb[2].mxu0  ;;  %v563_v59 = vld [vmem:[%s1280_s3] sm:$0xf] }
 0x10e   : > { %v484_v63 = vadd.f32 %v789_v61, %v291_v52  ;;  %v478_v0 = vpop.f32.mrb[3].mxu0 }
 0x10f   : > { %v479_v1 = vadd.f32 %v478_v0, %v286_v50 }
 0x110   : > { %924 = vtanh.f32 %v484_v63 }
 0x111   : > { %926 = vtanh.f32 %v479_v1  ;;  %v792_v2 = vpop.f32.mrb[4].mxu0 }
 0x112   : > { %v494_v3 = vadd.f32 %v792_v2, %v301_v54  ;;  %v488_v4 = vpop.f32.mrb[5].mxu0 }
 0x113   : > { %v489_v6 = vadd.f32 %v488_v4, %v296_v55 }
 0x114   : > { %928 = vtanh.f32 %v494_v3 }
 0x115   : > { %930 = vtanh.f32 %v489_v6  ;;  %v795_v8 = vpop.f32.mrb[6].mxu0 }
 0x116   : > { %v921_v9 = vpop.eup %920  ;;  %v504_v10 = vadd.f32 %v795_v8, %v311_v60  ;;  %v498_v11 = vpop.f32.mrb[7].mxu0 }
 0x117   : > { %v923_v12 = vpop.eup %922  ;;  %v499_v13 = vadd.f32 %v498_v11, %v306_v62  ;;  %v567_v60 = vpop.permute.xlu0 %566 }
 0x118   : > { %932 = vtanh.f32 %v504_v10  ;;  %v852_v14 = vpack.c.bf16 %v921_v9, %v923_v12 }
 0x119   : > { %934 = vtanh.f32 %v499_v13  ;;  %v798_v16 = vpop.f32.mrb[8].mxu0 }
 0x11a   : > { %v925_v17 = vpop.eup %924  ;;  %v514_v19 = vadd.f32 %v798_v16, %v321_v5  ;;  %v508_v20 = vpop.f32.mrb[9].mxu0  ;;  %853 = vmatpush3.bf16.msra.mxu1 %v852_v14 }
 0x11b   : > { %v927_v21 = vpop.eup %926  ;;  %v509_v22 = vadd.f32 %v508_v20, %v316_v7  ;;  %854 = vmatprep.subr.bf16.mxu1 %v1017_v48 }
 0x11c   : > { %936 = vtanh.f32 %v514_v19  ;;  %v855_v23 = vpack.c.bf16 %v925_v17, %v927_v21 }
 0x11d   : > { %938 = vtanh.f32 %v509_v22  ;;  %v801_v24 = vpop.f32.mrb[10].mxu0 }
 0x11e   : > { %v929_v25 = vpop.eup %928  ;;  %v524_v26 = vadd.f32 %v801_v24, %v331_v15  ;;  %v518_v27 = vpop.f32.mrb[11].mxu0  ;;  %856 = vmatpush3.bf16.msra.mxu1 %v855_v23 }
 0x11f   : > { %v931_v28 = vpop.eup %930  ;;  %v519_v30 = vadd.f32 %v518_v27, %v326_v18  ;;  %857 = vmatprep.subr.bf16.mxu1 %v1017_v48 }
 0x120   : > { %940 = vtanh.f32 %v524_v26  ;;  %v858_v32 = vpack.c.bf16 %v929_v25, %v931_v28 }
 0x121   : > { %942 = vtanh.f32 %v519_v30  ;;  %v804_v33 = vpop.f32.mrb[12].mxu0 }
 0x122   : > { %v933_v34 = vpop.eup %932  ;;  %v534_v35 = vadd.f32 %v804_v33, %v341_v29  ;;  %v528_v36 = vpop.f32.mrb[13].mxu0  ;;  %859 = vmatpush3.bf16.msra.mxu1 %v858_v32 }
 0x123   : > { %v935_v37 = vpop.eup %934  ;;  %v529_v38 = vadd.f32 %v528_v36, %v336_v31  ;;  %860 = vmatprep.subr.bf16.mxu1 %v1017_v48 }
 0x124   : > { %944 = vtanh.f32 %v534_v35  ;;  %v861_v39 = vpack.c.bf16 %v933_v34, %v935_v37 }
 0x125   : > { %946 = vtanh.f32 %v529_v38  ;;  %v807_v41 = vpop.f32.mrb[14].mxu0 }
 0x126   : > { %v937_v42 = vpop.eup %936  ;;  %v544_v44 = vadd.f32 %v807_v41, %v351_v40  ;;  %v538_v45 = vpop.f32.mrb[15].mxu0  ;;  %862 = vmatpush3.bf16.msra.mxu1 %v861_v39 }
 0x127   : > { %v939_v46 = vpop.eup %938  ;;  %v539_v47 = vadd.f32 %v538_v45, %v346_v43  ;;  %863 = vmatprep.subr.bf16.mxu1 %v1017_v48 }
 0x128   : > { %948 = vtanh.f32 %v544_v44  ;;  %v864_v49 = vpack.c.bf16 %v937_v42, %v939_v46 }
 0x129   : > { %950 = vtanh.f32 %v539_v47 }
 0x12a   : > { %v941_v50 = vpop.eup %940  ;;  %865 = vmatpush3.bf16.msra.mxu1 %v864_v49 }
 0x12b   : > { %v943_v51 = vpop.eup %942  ;;  %866 = vmatprep.subr.bf16.mxu1 %v1017_v48 }
 0x12c   : > { %v867_v52 = vpack.c.bf16 %v941_v50, %v943_v51 }
 0x12e   : > { %v945_v53 = vpop.eup %944  ;;  %868 = vmatpush3.bf16.msra.mxu1 %v867_v52 }
 0x12f   : > { %v947_v54 = vpop.eup %946  ;;  %869 = vmatprep.subr.bf16.mxu1 %v1017_v48 }
 0x130   : > { %v870_v55 = vpack.c.bf16 %v945_v53, %v947_v54 }
 0x132   : > { %v949_v56 = vpop.eup %948  ;;  %871 = vmatpush3.bf16.msra.mxu1 %v870_v55 }
 0x133   : > { %v951_v57 = vpop.eup %950  ;;  %872 = vmatprep.subr.bf16.mxu1 %v1017_v48 }
 0x134   : > { %v873_v58 = vpack.c.bf16 %v949_v56, %v951_v57 }
 0x136   : > { %874 = vmatpush3.bf16.msra.mxu1 %v873_v58 }
 0x139   : > { %841 = vmatmul.mubr.f32.vlgmr.msra.gmra.mrb[0].mxu1 %v563_v59 }
 0x20c   : > { %v635_v61 = vpop.f32.mrb[0].mxu1 }
 0x20d   : > { %v636_v62 = vadd.f32 %v635_v61, %v567_v60  ;;  %v842_v63 = vpop.f32.mrb[1].mxu1 }
 0x20f   : > { %639 = vst [vmem:[%s215_s17] sm:$0xf] %v636_v62 }
 0x210   : > { %965 = shalt.err (!%p962_p3)
}
 0x211   : > { %s966_s10 = scalar_lea.hbm %s1235_s30, 64  ;;  %s970_s13 = scalar_lea.hbm %s1282_s5, 192 }
 0x212   : > { %p967_p4 = scmp.ne.s32.totalorder %s1235_s30, %s966_s10  ;;  %p971_p9 = scmp.lt.u32.totalorder %s1235_s30, %s1282_s5 }
 0x213   : > { %p972_p10 = scmp.lt.u32.totalorder %s970_s13, %s966_s10  ;;  %p974_p12 = scmp.lt.u32.totalorder %s966_s10, %s1235_s30 }
 0x214   : > { %p968_p7 = pnand %p967_p4, %p1089_p5 }
 0x215   : > { %p973_p11 = por %p972_p10, %p971_p9 }
 0x216   : > { %p969_p8 = pneg %p968_p7 }
 0x217   : > { %p975_p13 = por %p974_p12, %p973_p11 }
 0x219   : > { %p976_p0 = pnand %p975_p13, %p969_p8 }
 0x21b   : > { %979 = shalt.err (!%p976_p0)
}
 0x21c   : > { %875 = dma.vmem_to_hbm [thread:$0]  (%p1089_p5), %s1237_s23, 64, %s1235_s30, %s641_s6  }
 0x21d PF: > { %p881_p1 = scmp.ge.s32.totalorder %s1014_s21, 2  ;;  %s666_s16 = sand.u32 1, %s1002_s18  }
 0x21e   : > { %s667_s17 = scalar_lea.sflag [#allocation4], %s666_s16 }
 0x21f   : > { %p878_p2 = pnand %p881_p1, %p1093_p6 }
 0x221   : > { %997 = dma.done.wait (!%p878_p2), %s667_s17, 64  }
 0x222   : > { %999 = vsyncadd (!%p878_p2), %s667_s17, 4294967232  ;;  %p15_p3 = scmp.ge.s32.totalorder %s1076_s24, 5   ;;  %s1285_s18 = smov %s1006_s19 }
 0x223   : > { %s1286_s19 = smov %s1010_s20  ;;  %s1287_s20 = smov %s1087_s27 }
 0x224   : > { %s1288_s21 = smov %s1076_s24  ;;  %17 = sbr.rel (!%p15_p3) target bundleno = 3 (0x3), region = 75 }
 0x22b   :  { %672 = vsyncpa [#allocation4], 1 }
 0x22c   :  { %674 = vsyncpa [#allocation4 + $0x1], 1 }

</bundles_post_ra>
